<compile_context>
chip_gen: v7x
topology: tpu7x:2x2x1
jax: 0.10.0
libtpu: 0.0.40
codegen_flags: <defaults>
</compile_context>

<pallas_src>
import functools

import jax
import jax.numpy as jnp
from jax.experimental import pallas as pl
from jax.experimental.pallas import tpu as pltpu


def _avg_channels_kernel(x_ref, o_ref, *, inv_c):
    # x_ref: (NB, C, ...) block in VMEM.  Accumulate in f32, scale by the
    # compile-time constant 1/C (single VPU multiply), cast back on store.
    x = x_ref[...].astype(jnp.float32)
    s = jnp.sum(x, axis=1, keepdims=True)
    o_ref[...] = (s * inv_c).astype(o_ref.dtype)


def _pick_spatial_tile(rows, c, itemsize, target_bytes=2 * 1024 * 1024):
    """Largest TS that (a) is a multiple of 8 (or == rows), (b) divides rows,
    and (c) keeps one per-batch input tile (C*TS*128*itemsize) near target."""
    if rows % 8 != 0:
        return rows
    ts_max = max(8, target_bytes // (c * 128 * itemsize))
    ts_max = min(ts_max, rows)
    k = ts_max // 8
    while k >= 1:
        cand = k * 8
        if rows % cand == 0:
            return cand
        k -= 1
    return rows


def _pick_batch_tile(n, per_batch_bytes, target_bytes=2 * 1024 * 1024):
    """Largest divisor of n whose combined input tile stays near target."""
    cap = max(1, target_bytes // max(1, per_batch_bytes))
    nb = 1
    for d in range(1, n + 1):
        if n % d == 0 and d <= cap:
            nb = d
    return nb


def _vmem_limit(in_tile_bytes, out_tile_bytes, itemsize):
    # double-buffered in/out + headroom for the f32 accumulation temp
    f32_temp = in_tile_bytes * max(1, 4 // itemsize)
    est = 4 * (in_tile_bytes + out_tile_bytes) + f32_temp
    return int(min(max(est, 32 * 1024 * 1024), 64 * 1024 * 1024))


def avg_channels(x):
    """x: (N, C, H, W) -> (N, 1, H, W), mean over channels (f32 accumulation)."""
    N, C, H, W = x.shape
    HW = H * W
    itemsize = jnp.dtype(x.dtype).itemsize
    kernel = functools.partial(_avg_channels_kernel, inv_c=1.0 / C)

    if HW % 128 == 0:
        # --- Lane-dense, (batch, spatial)-tiled path ------------------------
        R = HW // 128                      # rows of 128 lanes per (n, c) image
        xf = x.reshape(N, C, R, 128)       # free reshape for contiguous NCHW
        TS = _pick_spatial_tile(R, C, itemsize)
        n_sp = R // TS
        per_batch_in = C * TS * 128 * itemsize
        NB = _pick_batch_tile(N, per_batch_in)
        n_b = N // NB

        in_tile_bytes = NB * per_batch_in
        out_tile_bytes = NB * TS * 128 * itemsize

        out_flat = pl.pallas_call(
            kernel,
            out_shape=jax.ShapeDtypeStruct((N, 1, R, 128), x.dtype),
            grid_spec=pltpu.PrefetchScalarGridSpec(
                num_scalar_prefetch=0,
                grid=(n_b, n_sp),
                in_specs=[
                    pl.BlockSpec((NB, C, TS, 128), lambda n, s: (n, 0, s, 0)),
                ],
                out_specs=pl.BlockSpec((NB, 1, TS, 128),
                                       lambda n, s: (n, 0, s, 0)),
            ),
            compiler_params=pltpu.CompilerParams(
                dimension_semantics=("parallel", "parallel"),
                vmem_limit_bytes=_vmem_limit(in_tile_bytes, out_tile_bytes,
                                             itemsize),
            ),
        )(xf)
        return out_flat.reshape(N, 1, H, W)

    # --- Fallback: H*W not a multiple of 128 -------------------------------
    # Flatten H*W onto the lane axis (denser than raw NCHW with W < 128);
    # last two block dims equal the full array dims so the tiling rule holds.
    xf = x.reshape(N, C, HW)
    per_batch_in = C * HW * itemsize
    NB = _pick_batch_tile(N, per_batch_in)
    n_b = N // NB
    in_tile_bytes = NB * per_batch_in
    out_tile_bytes = NB * HW * itemsize

    out_flat = pl.pallas_call(
        kernel,
        out_shape=jax.ShapeDtypeStruct((N, 1, HW), x.dtype),
        grid_spec=pltpu.PrefetchScalarGridSpec(
            num_scalar_prefetch=0,
            grid=(n_b,),
            in_specs=[pl.BlockSpec((NB, C, HW), lambda n: (n, 0, 0))],
            out_specs=pl.BlockSpec((NB, 1, HW), lambda n: (n, 0, 0)),
        ),
        compiler_params=pltpu.CompilerParams(
            dimension_semantics=("parallel",),
            vmem_limit_bytes=_vmem_limit(in_tile_bytes, out_tile_bytes,
                                         itemsize),
        ),
    )(xf)
    return out_flat.reshape(N, 1, H, W)


if __name__ == "__main__":
    key = jax.random.PRNGKey(0)
    x = jax.random.normal(key, (2, 4, 16, 16), dtype=jnp.float32)

    out = jax.block_until_ready(avg_channels(x))

    # Reference check (same semantics as torch.mean(dim=1, keepdim=True)).
    ref = jnp.mean(x, axis=1, keepdims=True)
    assert out.shape == (2, 1, 16, 16), out.shape
    assert jnp.allclose(out, ref, atol=1e-6, rtol=1e-6)

    # Also exercise the non-128-multiple fallback path on a tiny odd shape.
    x2 = jax.random.normal(key, (2, 3, 5, 7), dtype=jnp.float32)
    out2 = jax.block_until_ready(avg_channels(x2))
    assert jnp.allclose(out2, jnp.mean(x2, axis=1, keepdims=True),
                        atol=1e-6, rtol=1e-6)

    print("KERNEL_OK")
</pallas_src>

<mosaic_0001>
module attributes {stable_mosaic.version = 11 : i64} {
  func.func @_avg_channels_kernel(%arg0: i32, %arg1: i32, %arg2: memref<2x4x2x128xf32, #tpu.memory_space<vmem>>, %arg3: memref<2x1x2x128xf32, #tpu.memory_space<vmem>>) attributes {dimension_semantics = [#tpu.dimension_semantics<parallel>, #tpu.dimension_semantics<parallel>], iteration_bounds = array<i64: 1, 1>, scalar_prefetch = 0 : i64, scratch_operands = 0 : i64, tpu.core_type = #tpu.core_type<tc>, window_params = [{transform_indices = @transform_0, window_bounds = array<i64: 2, 4, 2, 128>}, {transform_indices = @transform_1, window_bounds = array<i64: 2, 1, 2, 128>}]} {
    %c0 = arith.constant 0 : index
    %c0_0 = arith.constant 0 : index
    %c0_1 = arith.constant 0 : index
    %c0_2 = arith.constant 0 : index
    %0 = vector.load %arg2[%c0, %c0_0, %c0_1, %c0_2] : memref<2x4x2x128xf32, #tpu.memory_space<vmem>>, vector<2x4x2x128xf32>
    %cst = arith.constant dense<0.000000e+00> : vector<2x2x128xf32>
    %1 = vector.multi_reduction <add>, %0, %cst [1] : vector<2x4x2x128xf32> to vector<2x2x128xf32>
    %2 = vector.shape_cast %1 : vector<2x2x128xf32> to vector<2x1x2x128xf32>
    %cst_3 = arith.constant 2.500000e-01 : f32
    %3 = vector.broadcast %cst_3 : f32 to vector<2x1x2x128xf32>
    %4 = arith.mulf %2, %3 : vector<2x1x2x128xf32>
    %c0_4 = arith.constant 0 : index
    %c0_5 = arith.constant 0 : index
    %c0_6 = arith.constant 0 : index
    %c0_7 = arith.constant 0 : index
    %5 = vector.load %arg3[%c0_4, %c0_5, %c0_6, %c0_7] : memref<2x1x2x128xf32, #tpu.memory_space<vmem>>, vector<2x1x2x128xf32>
    tpu.vector_store %arg3[%c0_4, %c0_5, %c0_6, %c0_7], %4 {strides = array<i32>} : memref<2x1x2x128xf32, #tpu.memory_space<vmem>>, vector<2x1x2x128xf32>,
    return
  }
  func.func @transform_0(%arg0: i32, %arg1: i32) -> (i32, i32, i32, i32) {
    %c0_i32 = arith.constant 0 : i32
    %c0_i32_0 = arith.constant 0 : i32
    %c0_i32_1 = arith.constant 0 : i32
    return %arg0, %c0_i32, %arg1, %c0_i32_0 : i32, i32, i32, i32
  }
  func.func @transform_1(%arg0: i32, %arg1: i32) -> (i32, i32, i32, i32) {
    %c0_i32 = arith.constant 0 : i32
    %c0_i32_0 = arith.constant 0 : i32
    %c0_i32_1 = arith.constant 0 : i32
    return %arg0, %c0_i32, %arg1, %c0_i32_0 : i32, i32, i32, i32
  }
}

</mosaic_0001>

<bundles_post_ra>
// kernel: tpu_custom_call.1
= control target key start
LH: loop header
LB: loop body
LE: loop exit
PB: predicated region body
PF: predicated region fallthrough
CT: control target
= control target key end

     0   :  { %6 = vsyncpa [#allocation3], 0  ;;  %s171_s0 = inlined_call_operand.hbm [shape: f32[2,4,2,128], index: 0, kind: input, shape index: {}]   ;;  %s172_s1 = inlined_call_operand.hbm [shape: f32[2,1,2,128], index: 1, kind: output, shape index: {}]  }
   0x1   :  { %7 = vsyncpa [#allocation4], 0  ;;  %s119_s6 = smov [#allocation2]   ;;  %s71_s10 = scalar_lea.hbm %s171_s0, 256 }
   0x2   :  { %s13_s7 = sshll.u32 %s119_s6, 4  ;;  %p72_p0 = scmp.ne.s32.totalorder %s171_s0, %s71_s10  ;;  %s14_s7 = int_to_ptr.vmem [resolvable:$true] %s13_s7 }
   0x3   :  { %p75_p1 = scmp.lt.u32.totalorder %s71_s10, %s171_s0 }
   0x5   :  { %p77_p2 = pnand %p75_p1, %p72_p0 }
   0x7   :  { %80 = shalt.err (!%p77_p2)
}
   0x8   :  { %s81_s15 = scalar_lea.vmem %s14_s7, 256  ;;  %p86_p4 = scmp.lt.s32.totalorder %s14_s7, %s14_s7 }
   0x9   :  { %p82_p3 = scmp.ne.s32.totalorder %s14_s7, %s81_s15  ;;  %p87_p5 = scmp.lt.s32.totalorder %s81_s15, %s81_s15 }
   0xb   :  { %p88_p6 = por %p87_p5, %p86_p4 }
   0xd   :  { %p89_p7 = pnand %p88_p6, %p82_p3 }
   0xf   :  { %92 = shalt.err (!%p89_p7)
}
  0x10   :  { %s120_s16 = smov 32   ;;  %s121_s17 = smov 2  }
  0x11   :  { %19 = dma.hbm_to_vmem [thread:$0]  %s171_s0, 256, %s14_s7, [#allocation3], %s120_s16, %s120_s16, %s121_s17  }
  0x12   :  { %115 = dma.done.wait [#allocation3], 256  }
  0x13   :  { %116 = vsyncadd [#allocation3], 4294967040  ;;  %vm31_vm0 = vcmask 1041408   ;;  %v23_v0 = vld [vmem:[#allocation2] sm:$0x3]  ;;  %s122_s0 = smov [#allocation5]  }
  0x14   :  { %v24_v1 = vld [vmem:[#allocation2 + $0x2] sm:$0x3]  ;;  %v25_v2 = vld [vmem:[#allocation2 + $0x4] sm:$0x3]  ;;  %v26_v3 = vld [vmem:[#allocation2 + $0x6] sm:$0x3] }
  0x15   :  { %v32_v4 = vsel %vm31_vm0, %v23_v0, 0.0  ;;  %v33_v5 = vsel %vm31_vm0, %v24_v1, 0.0  ;;  %v35_v6 = vsel %vm31_vm0, %v25_v2, 0.0  ;;  %v37_v8 = vsel %vm31_vm0, %v26_v3, 0.0  ;;  %v27_v9 = vld [vmem:[#allocation2 + $0x8] sm:$0x3] }
  0x16   :  { %v34_v7 = vadd.f32 %v33_v5, %v32_v4  ;;  %v28_v10 = vld [vmem:[#allocation2 + $0xa] sm:$0x3]  ;;  %v29_v11 = vld [vmem:[#allocation2 + $0xc] sm:$0x3]  ;;  %v30_v12 = vld [vmem:[#allocation2 + $0xe] sm:$0x3] }
  0x17   :  { %v39_v13 = vsel %vm31_vm0, %v27_v9, 0.0  ;;  %v40_v14 = vsel %vm31_vm0, %v28_v10, 0.0  ;;  %v42_v17 = vsel %vm31_vm0, %v29_v11, 0.0  ;;  %v44_v18 = vsel %vm31_vm0, %v30_v12, 0.0  ;;  %s55_s20 = sshll.u32 %s122_s0, 4  ;;  %s56_s20 = int_to_ptr.vmem [resolvable:$true] %s55_s20 }
  0x18   :  { %v36_v15 = vadd.f32 %v35_v6, %v34_v7  ;;  %v41_v16 = vadd.f32 %v40_v14, %v39_v13  ;;  %s93_s21 = scalar_lea.vmem %s56_s20, 64  ;;  %p98_p9 = scmp.lt.s32.totalorder %s56_s20, %s56_s20 }
  0x19   :  { %p94_p8 = scmp.ne.s32.totalorder %s56_s20, %s93_s21  ;;  %p99_p10 = scmp.lt.s32.totalorder %s93_s21, %s93_s21 }
  0x1a   :  { %v38_v19 = vadd.f32 %v37_v8, %v36_v15  ;;  %v43_v20 = vadd.f32 %v42_v17, %v41_v16 }
  0x1b   :  { %p100_p11 = por %p99_p10, %p98_p9 }
  0x1c   :  { %v46_v21 = vmul.f32 0.25, %v38_v19  ;;  %v45_v22 = vadd.f32 %v44_v18, %v43_v20 }
  0x1d   :  { %p101_p12 = pnand %p100_p11, %p94_p8 }
  0x1e   :  { %48 = vst [vmem:[#allocation5] sm:$0x3] %v46_v21  ;;  %v47_v23 = vmul.f32 0.25, %v45_v22 }
  0x20   :  { %49 = vst [vmem:[#allocation5 + $0x2] sm:$0x3] %v47_v23 }
  0x21   :  { %104 = shalt.err (!%p101_p12)
}
  0x22   :  { %s105_s24 = scalar_lea.hbm %s172_s1, 64 }
  0x23   :  { %p106_p13 = scmp.ne.s32.totalorder %s172_s1, %s105_s24  ;;  %p109_p0 = scmp.lt.u32.totalorder %s105_s24, %s172_s1 }
  0x25   :  { %p111_p1 = pnand %p109_p0, %p106_p13 }
  0x27   :  { %114 = shalt.err (!%p111_p1)
}
  0x28   :  { %61 = dma.vmem_to_hbm [thread:$0]  %s56_s20, 64, %s172_s1, [#allocation4], %s120_s16, %s120_s16, %s121_s17  }
  0x29   :  { %117 = dma.done.wait [#allocation4], 64  }
  0x2a   :  { %118 = vsyncadd [#allocation4], 4294967232 }
  0x2b   :  { %65 = vsyncpa [#allocation3], 1 }
  0x2c   :  { %66 = vsyncpa [#allocation4], 1 }

</bundles_post_ra>
